<compile_context>
chip_gen: v6e
topology: v6e:2x2x1
jax: 0.10.0
libtpu: 0.0.40
codegen_flags: <defaults>
</compile_context>

<pallas_src>
import functools

import jax
import jax.numpy as jnp
from jax.experimental import pallas as pl
from jax.experimental.pallas import tpu as pltpu


def _conv_stats_kernel(w_ref, b_ref, p_ref, conv_ref, sum_ref, ssq_ref):
    """Pass 1: conv tile + per-channel sum / sum-of-squares accumulation.

    w_ref   : (Cout, K)      folded 3x3 weights (K = 9*Cin)
    b_ref   : (Cout, 1)      conv bias
    p_ref   : (K, TN)        im2col patch tile (lane-dense)
    conv_ref: (Cout, TN)     conv(+bias) output tile
    sum_ref : (Cout, 1)      running per-channel sum   (resident across grid)
    ssq_ref : (Cout, 1)      running per-channel sum^2 (resident across grid)
    """
    @pl.when(pl.program_id(0) == 0)
    def _():
        sum_ref[...] = jnp.zeros_like(sum_ref)
        ssq_ref[...] = jnp.zeros_like(ssq_ref)

    acc = jnp.dot(w_ref[...], p_ref[...], preferred_element_type=jnp.float32)
    acc = acc + b_ref[...]                       # (Cout, TN), f32
    conv_ref[...] = acc
    sum_ref[...] = sum_ref[...] + jnp.sum(acc, axis=1, keepdims=True)
    ssq_ref[...] = ssq_ref[...] + jnp.sum(acc * acc, axis=1, keepdims=True)


def _bn_relu_kernel(sum_ref, ssq_ref, g_ref, be_ref, conv_ref, out_ref, *,
                    inv_count, eps):
    """Pass 2: BatchNorm (batch stats, folded into scale/shift) + ReLU per tile."""
    mean = sum_ref[...] * inv_count                          # (Cout, 1)
    var = ssq_ref[...] * inv_count - mean * mean             # biased variance
    scale = g_ref[...] * jax.lax.rsqrt(var + eps)            # (Cout, 1)
    shift = be_ref[...] - mean * scale
    out_ref[...] = jnp.maximum(conv_ref[...] * scale + shift, 0.0)


def convnet_block(x_nchw, w_oihw, b, gamma, beta, *, eps=1e-5,
                  max_tile_lanes=256, matmul_dtype=jnp.float32):
    """Forward pass of ConvNetBlock. x_nchw: (N, Cin, H, W). Returns (N, Cout, H, W).

    max_tile_lanes: lane width of each spatial tile (multiple of 128). 256 keeps the
    small demo multi-tile; raise toward 1024-2048 for large inputs to fill VMEM.
    matmul_dtype: set to jnp.bfloat16 on v6e/v7x for MXU-native operands (acc stays f32).
    """
    N, Cin, H, W = x_nchw.shape
    Cout, _, KH, KW = w_oihw.shape
    pad = 1                                  # kernel_size=3, stride=1, padding=1
    NHW = N * H * W
    K = KH * KW * Cin

    # --- Wrapper-side glue (XLA): pad + im2col into a lane-dense (K, N*H*W) slab.
    x = x_nchw.astype(jnp.float32)
    xpad = jnp.pad(x, ((0, 0), (0, 0), (pad, pad), (pad, pad)))
    taps = []
    for kh in range(KH):
        for kw in range(KW):
            t = xpad[:, :, kh:kh + H, kw:kw + W]                   # (N, Cin, H, W)
            taps.append(jnp.transpose(t, (1, 0, 2, 3)).reshape(Cin, NHW))
    patches = jnp.concatenate(taps, axis=0)                        # (K, NHW)
    # Weights folded to (Cout, K), row order tap-major / channel-minor to match patches.
    wmat = jnp.transpose(w_oihw.astype(jnp.float32), (0, 2, 3, 1)).reshape(Cout, K)

    if matmul_dtype != jnp.float32:
        patches = patches.astype(matmul_dtype)
        wmat = wmat.astype(matmul_dtype)

    b2 = b.reshape(Cout, 1).astype(jnp.float32)
    g2 = gamma.reshape(Cout, 1).astype(jnp.float32)
    be2 = beta.reshape(Cout, 1).astype(jnp.float32)

    # --- Lane tiling over the flattened spatial axis.
    tn = NHW
    for cand in (2048, 1024, 512, 256, 128):
        if cand <= max_tile_lanes and NHW % cand == 0:
            tn = cand
            break
    grid = (NHW // tn,)

    # --- Pass 1: conv + per-channel stats (reduction across the grid -> "arbitrary").
    conv2d, csum, cssq = pl.pallas_call(
        _conv_stats_kernel,
        out_shape=(
            jax.ShapeDtypeStruct((Cout, NHW), jnp.float32),
            jax.ShapeDtypeStruct((Cout, 1), jnp.float32),
            jax.ShapeDtypeStruct((Cout, 1), jnp.float32),
        ),
        grid=grid,
        in_specs=[
            pl.BlockSpec((Cout, K), lambda i: (0, 0)),
            pl.BlockSpec((Cout, 1), lambda i: (0, 0)),
            pl.BlockSpec((K, tn), lambda i: (0, i)),
        ],
        out_specs=(
            pl.BlockSpec((Cout, tn), lambda i: (0, i)),
            pl.BlockSpec((Cout, 1), lambda i: (0, 0)),
            pl.BlockSpec((Cout, 1), lambda i: (0, 0)),
        ),
        compiler_params=pltpu.CompilerParams(
            dimension_semantics=("arbitrary",)),
    )(wmat, b2, patches)

    # --- Pass 2: normalize + affine + ReLU (independent tiles -> "parallel").
    kernel2 = functools.partial(_bn_relu_kernel,
                                inv_count=1.0 / float(NHW), eps=float(eps))
    out2d = pl.pallas_call(
        kernel2,
        out_shape=jax.ShapeDtypeStruct((Cout, NHW), jnp.float32),
        grid=grid,
        in_specs=[
            pl.BlockSpec((Cout, 1), lambda i: (0, 0)),
            pl.BlockSpec((Cout, 1), lambda i: (0, 0)),
            pl.BlockSpec((Cout, 1), lambda i: (0, 0)),
            pl.BlockSpec((Cout, 1), lambda i: (0, 0)),
            pl.BlockSpec((Cout, tn), lambda i: (0, i)),
        ],
        out_specs=pl.BlockSpec((Cout, tn), lambda i: (0, i)),
        compiler_params=pltpu.CompilerParams(
            dimension_semantics=("parallel",)),
    )(csum, cssq, g2, be2, conv2d)

    # Back to the module's NCHW interface.
    return jnp.transpose(out2d.reshape(Cout, N, H, W), (1, 0, 2, 3))


def _reference(x_nchw, w_oihw, b, gamma, beta, eps=1e-5):
    """Pure-JAX reference (lax conv + training-mode BN + ReLU) in NCHW."""
    y = jax.lax.conv_general_dilated(
        x_nchw.astype(jnp.float32), w_oihw.astype(jnp.float32),
        window_strides=(1, 1), padding=((1, 1), (1, 1)),
        dimension_numbers=("NCHW", "OIHW", "NCHW"))
    y = y + b.reshape(1, -1, 1, 1)
    mean = jnp.mean(y, axis=(0, 2, 3), keepdims=True)
    var = jnp.mean((y - mean) ** 2, axis=(0, 2, 3), keepdims=True)
    y = (y - mean) * jax.lax.rsqrt(var + eps)
    y = y * gamma.reshape(1, -1, 1, 1) + beta.reshape(1, -1, 1, 1)
    return jnp.maximum(y, 0.0)


if __name__ == "__main__":
    # Small shapes consistent with the module: batch=2, in_channels=4,
    # out_channels=8, spatial=16x16.
    N, Cin, Cout, H, W = 2, 4, 8, 16, 16

    key = jax.random.PRNGKey(0)
    kx, kw, kb, kg, kbe = jax.random.split(key, 5)

    x = jax.random.normal(kx, (N, Cin, H, W), dtype=jnp.float32)
    w = jax.random.normal(kw, (Cout, Cin, 3, 3), dtype=jnp.float32) * 0.1
    b = jax.random.normal(kb, (Cout,), dtype=jnp.float32) * 0.1
    gamma = 1.0 + 0.1 * jax.random.normal(kg, (Cout,), dtype=jnp.float32)
    beta = 0.1 * jax.random.normal(kbe, (Cout,), dtype=jnp.float32)

    out = convnet_block(x, w, b, gamma, beta)
    out = jax.block_until_ready(out)

    ref = jax.block_until_ready(_reference(x, w, b, gamma, beta))
    assert out.shape == (N, Cout, H, W)
    assert jnp.allclose(out, ref, rtol=2e-3, atol=2e-3), (
        f"max abs err = {jnp.max(jnp.abs(out - ref))}")

    print("KERNEL_OK")
</pallas_src>

<mosaic_0001>
module attributes {stable_mosaic.version = 11 : i64} {
  func.func @_conv_stats_kernel(%arg0: i32, %arg1: memref<8x36xf32, #tpu.memory_space<vmem>>, %arg2: memref<8x1xf32, #tpu.memory_space<vmem>>, %arg3: memref<36x256xf32, #tpu.memory_space<vmem>>, %arg4: memref<8x256xf32, #tpu.memory_space<vmem>>, %arg5: memref<8x1xf32, #tpu.memory_space<vmem>>, %arg6: memref<8x1xf32, #tpu.memory_space<vmem>>) attributes {dimension_semantics = [#tpu.dimension_semantics<arbitrary>], iteration_bounds = array<i64: 2>, scalar_prefetch = 0 : i64, scratch_operands = 0 : i64, tpu.core_type = #tpu.core_type<tc>, window_params = [{pipeline_mode = #tpu.pipeline_mode<synchronous>, transform_indices = @transform_0, window_bounds = array<i64: 8, 36>}, {pipeline_mode = #tpu.pipeline_mode<synchronous>, transform_indices = @transform_1, window_bounds = array<i64: 8, 1>}, {transform_indices = @transform_2, window_bounds = array<i64: 36, 256>}, {transform_indices = @transform_3, window_bounds = array<i64: 8, 256>}, {pipeline_mode = #tpu.pipeline_mode<synchronous>, transform_indices = @transform_4, window_bounds = array<i64: 8, 1>}, {pipeline_mode = #tpu.pipeline_mode<synchronous>, transform_indices = @transform_5, window_bounds = array<i64: 8, 1>}]} {
    %c0_i32 = arith.constant 0 : i32
    %0 = arith.cmpi eq, %arg0, %c0_i32 : i32
    %1 = arith.extui %0 : i1 to i32
    %c0_i32_0 = arith.constant 0 : i32
    %2 = arith.cmpi ne, %1, %c0_i32_0 : i32
    scf.if %2 {
      %cst_18 = arith.constant 0.000000e+00 : f32
      %21 = vector.broadcast %cst_18 : f32 to vector<8x1xf32>
      %c0_19 = arith.constant 0 : index
      %c0_20 = arith.constant 0 : index
      %22 = vector.load %arg5[%c0_19, %c0_20] : memref<8x1xf32, #tpu.memory_space<vmem>>, vector<8x1xf32>
      tpu.vector_store %arg5[%c0_19, %c0_20], %21 {strides = array<i32>} : memref<8x1xf32, #tpu.memory_space<vmem>>, vector<8x1xf32>,
      %cst_21 = arith.constant 0.000000e+00 : f32
      %23 = vector.broadcast %cst_21 : f32 to vector<8x1xf32>
      %c0_22 = arith.constant 0 : index
      %c0_23 = arith.constant 0 : index
      %24 = vector.load %arg6[%c0_22, %c0_23] : memref<8x1xf32, #tpu.memory_space<vmem>>, vector<8x1xf32>
      tpu.vector_store %arg6[%c0_22, %c0_23], %23 {strides = array<i32>} : memref<8x1xf32, #tpu.memory_space<vmem>>, vector<8x1xf32>,
    } else {
    }
    %c0 = arith.constant 0 : index
    %c0_1 = arith.constant 0 : index
    %3 = vector.load %arg1[%c0, %c0_1] : memref<8x36xf32, #tpu.memory_space<vmem>>, vector<8x36xf32>
    %c0_2 = arith.constant 0 : index
    %c0_3 = arith.constant 0 : index
    %4 = vector.load %arg3[%c0_2, %c0_3] : memref<36x256xf32, #tpu.memory_space<vmem>>, vector<36x256xf32>
    %cst = arith.constant dense<0.000000e+00> : vector<8x256xf32>
    %5 = tpu.matmul %3, %4, %cst {dimension_numbers = #tpu.dot_dimension_numbers<[1], [0], [0], [1], [0, 0, 1, 1], [], []>} : vector<8x36xf32>, vector<36x256xf32>, vector<8x256xf32> -> vector<8x256xf32>
    %c0_4 = arith.constant 0 : index
    %c0_5 = arith.constant 0 : index
    %6 = vector.load %arg2[%c0_4, %c0_5] : memref<8x1xf32, #tpu.memory_space<vmem>>, vector<8x1xf32>
    %7 = vector.broadcast %6 : vector<8x1xf32> to vector<8x256xf32>
    %8 = arith.addf %5, %7 : vector<8x256xf32>
    %c0_6 = arith.constant 0 : index
    %c0_7 = arith.constant 0 : index
    %9 = vector.load %arg4[%c0_6, %c0_7] : memref<8x256xf32, #tpu.memory_space<vmem>>, vector<8x256xf32>
    tpu.vector_store %arg4[%c0_6, %c0_7], %8 {strides = array<i32>} : memref<8x256xf32, #tpu.memory_space<vmem>>, vector<8x256xf32>,
    %c0_8 = arith.constant 0 : index
    %c0_9 = arith.constant 0 : index
    %10 = vector.load %arg5[%c0_8, %c0_9] : memref<8x1xf32, #tpu.memory_space<vmem>>, vector<8x1xf32>
    %cst_10 = arith.constant dense<0.000000e+00> : vector<8xf32>
    %11 = vector.multi_reduction <add>, %8, %cst_10 [1] : vector<8x256xf32> to vector<8xf32>
    %12 = vector.shape_cast %11 : vector<8xf32> to vector<8x1xf32>
    %13 = arith.addf %10, %12 : vector<8x1xf32>
    %c0_11 = arith.constant 0 : index
    %c0_12 = arith.constant 0 : index
    %14 = vector.load %arg5[%c0_11, %c0_12] : memref<8x1xf32, #tpu.memory_space<vmem>>, vector<8x1xf32>
    tpu.vector_store %arg5[%c0_11, %c0_12], %13 {strides = array<i32>} : memref<8x1xf32, #tpu.memory_space<vmem>>, vector<8x1xf32>,
    %c0_13 = arith.constant 0 : index
    %c0_14 = arith.constant 0 : index
    %15 = vector.load %arg6[%c0_13, %c0_14] : memref<8x1xf32, #tpu.memory_space<vmem>>, vector<8x1xf32>
    %16 = arith.mulf %8, %8 : vector<8x256xf32>
    %cst_15 = arith.constant dense<0.000000e+00> : vector<8xf32>
    %17 = vector.multi_reduction <add>, %16, %cst_15 [1] : vector<8x256xf32> to vector<8xf32>
    %18 = vector.shape_cast %17 : vector<8xf32> to vector<8x1xf32>
    %19 = arith.addf %15, %18 : vector<8x1xf32>
    %c0_16 = arith.constant 0 : index
    %c0_17 = arith.constant 0 : index
    %20 = vector.load %arg6[%c0_16, %c0_17] : memref<8x1xf32, #tpu.memory_space<vmem>>, vector<8x1xf32>
    tpu.vector_store %arg6[%c0_16, %c0_17], %19 {strides = array<i32>} : memref<8x1xf32, #tpu.memory_space<vmem>>, vector<8x1xf32>,
    return
  }
  func.func @transform_0(%arg0: i32) -> (i32, i32) {
    %c0_i32 = arith.constant 0 : i32
    %c0_i32_0 = arith.constant 0 : i32
    %c0_i32_1 = arith.constant 0 : i32
    return %c0_i32, %c0_i32_0 : i32, i32
  }
  func.func @transform_1(%arg0: i32) -> (i32, i32) {
    %c0_i32 = arith.constant 0 : i32
    %c0_i32_0 = arith.constant 0 : i32
    %c0_i32_1 = arith.constant 0 : i32
    return %c0_i32, %c0_i32_0 : i32, i32
  }
  func.func @transform_2(%arg0: i32) -> (i32, i32) {
    %c0_i32 = arith.constant 0 : i32
    %c0_i32_0 = arith.constant 0 : i32
    return %c0_i32, %arg0 : i32, i32
  }
  func.func @transform_3(%arg0: i32) -> (i32, i32) {
    %c0_i32 = arith.constant 0 : i32
    %c0_i32_0 = arith.constant 0 : i32
    return %c0_i32, %arg0 : i32, i32
  }
  func.func @transform_4(%arg0: i32) -> (i32, i32) {
    %c0_i32 = arith.constant 0 : i32
    %c0_i32_0 = arith.constant 0 : i32
    %c0_i32_1 = arith.constant 0 : i32
    return %c0_i32, %c0_i32_0 : i32, i32
  }
  func.func @transform_5(%arg0: i32) -> (i32, i32) {
    %c0_i32 = arith.constant 0 : i32
    %c0_i32_0 = arith.constant 0 : i32
    %c0_i32_1 = arith.constant 0 : i32
    return %c0_i32, %c0_i32_0 : i32, i32
  }
}

</mosaic_0001>

<bundles_post_ra>
// kernel: tpu_custom_call.1
= control target key start
LH: loop header
LB: loop body
LE: loop exit
PB: predicated region body
PF: predicated region fallthrough
CT: control target
= control target key end

     0   :  { %11 = vsyncpa [#allocation3], 0  ;;  %s844_s0 = inlined_call_operand.vmem [shape: f32[8,36], index: 0, kind: input, shape index: {}]   ;;  %s845_s1 = inlined_call_operand.vmem [shape: f32[8,1], index: 1, kind: input, shape index: {}]   ;;  %s846_s2 = inlined_call_operand.hbm [shape: f32[36,512], index: 2, kind: input, shape index: {}]   ;;  %s847_s3 = inlined_call_operand.hbm [shape: f32[8,512], index: 3, kind: output, shape index: {0}]   ;;  %s848_s4 = inlined_call_operand.vmem [shape: f32[8,1], index: 4, kind: output, shape index: {1}]   ;;  %s849_s5 = inlined_call_operand.vmem [shape: f32[8,1], index: 5, kind: output, shape index: {2}]  }
   0x1   :  { %13 = vsyncpa [#allocation3 + $0x1], 0 }
   0x2   :  { %14 = vsyncpa [#allocation4], 0 }
   0x3   :  { %16 = vsyncpa [#allocation4 + $0x1], 0  ;;  %s665_s18 = smov 0   ;;  %s667_s19 = smov 0  }
   0x4   :  { %s669_s20 = smov 0   ;;  %s671_s21 = smov 0  }
   0x5 LB: > { %s686_s22 = sadd.s32 4294967295, %s625_s21   ;;  %s460_s23 = sadd.s32 4294967294, %s625_s21   ;;  %s625_s21 = sphi %s671_s21, %s864_s21   ;;  %s621_s20 = sphi %s669_s20, %s863_s20   ;;  %s617_s19 = sphi %s667_s19, %s862_s19   ;;  %s613_s18 = sphi %s665_s18, %s861_s18  }
   0x6   : > { %s690_s24 = sadd.s32 1, %s625_s21   ;;  %s71_s25 = sadd.s32 1, %s621_s20 }
   0x7   : > { %s68_s26 = ssub.s32 %s625_s21, %s690_s24  ;;  %p78_p0 = scmp.ne.s32.totalorder %s621_s20, %s617_s19 }
   0x8   : > { %p69_p1 = scmp.eq.s32.totalorder %s68_s26, 0  ;;  %p79_p2 = scmp.eq.s32.totalorder %s625_s21, 0 }
   0x9   : > { %p84_p3 = scmp.ne.s32.totalorder %s617_s19, %s613_s18  ;;  %p85_p4 = scmp.eq.s32.totalorder %s686_s22, 0 }
   0xa   : > { %s702_s27 = scalar_select %p69_p1, %s621_s20, %s71_s25  }
   0xb   : > { %p80_p5 = por %p79_p2, %p78_p0  ;;  %p704_p6 = por %p85_p4, %p84_p3 }
   0xc   : > { %p108_p7 = scmp.eq.s32.totalorder %s686_s22, 1  ;;  %p114_p8 = scmp.eq.s32.totalorder %s460_s23, 1 }
   0xd   : > { %s852_s28 = scalar_select %p704_p6, 1, 0 }
   0xe   : > { %p492_p10 = scmp.lt.s32.totalorder %s625_s21, 2  ;;  %p711_p11 = por %p108_p7, %p78_p0 }
   0xf   : > { %p715_p12 = por %p114_p8, %p84_p3  ;;  %s182_s6 = sand.u32 1, %s621_s20  }
  0x10   : > { %s853_s29 = scalar_select %p711_p11, 1, 0 }
  0x11   : > { %s854_s30 = scalar_select %p715_p12, 1, 0 }
  0x12   : > { %s476_s7 = sshll.u32 %s625_s21, 8  ;;  %s478_s8 = smul.u32 80, %s182_s6 }
  0x13   : > { %s724_s11 = scalar_lea.hbm %s846_s2, %s476_s7  ;;  %p726_p13 = pnand %p492_p10, %p80_p5 }
  0x14   : > { %s186_s13 = scalar_lea.vmem [#allocation2], %s478_s8  ;;  %s733_s15 = scalar_lea.sflag [#allocation3], %s182_s6 }
  0x15   : > { %s193_s14 = sshll.u32 %s186_s13, 4  ;;  %s533_s16 = scalar_lea.hbm %s724_s11, 1280  ;;  %s730_s14 = int_to_ptr.vmem [resolvable:$true] %s193_s14 }
  0x16   : > { %p534_p1 = scmp.ne.s32.totalorder %s724_s11, %s533_s16  ;;  %p535_p2 = pneg %p726_p13 }
  0x17   : > { %s538_s25 = scalar_lea.hbm %s846_s2, 2560  ;;  %p539_p5 = scmp.lt.s32.totalorder %s724_s11, %s846_s2 }
  0x18   : > { %p536_p3 = pnand %p535_p2, %p534_p1  ;;  %p540_p7 = scmp.lt.s32.totalorder %s538_s25, %s533_s16 }
  0x1a   : > { %p537_p4 = pneg %p536_p3  ;;  %p541_p8 = por %p540_p7, %p539_p5 }
  0x1c   : > { %p542_p10 = pnand %p541_p8, %p537_p4 }
  0x1e   : > { %545 = shalt.err (!%p542_p10)
}
  0x1f   : > { %s546_s6 = scalar_lea.vmem %s730_s14, 1280  ;;  %s627_s8 = smov [#allocation2]  }
  0x20   : > { %p547_p9 = scmp.ne.s32.totalorder %s730_s14, %s546_s6  ;;  %s551_s9 = sshll.u32 %s627_s8, 4  ;;  %s552_s9 = int_to_ptr.vmem [resolvable:$false] %s551_s9 }
  0x21   : > { %s553_s10 = scalar_lea.vmem %s552_s9, 2560  ;;  %p554_p3 = scmp.lt.s32.totalorder %s730_s14, %s552_s9 }
  0x22   : > { %p549_p0 = pnand %p547_p9, %p535_p2  ;;  %p555_p12 = scmp.lt.s32.totalorder %s553_s10, %s546_s6 }
  0x24   : > { %p550_p1 = pneg %p549_p0  ;;  %p556_p11 = por %p555_p12, %p554_p3 }
  0x26   : > { %p557_p6 = pnand %p556_p11, %p550_p1 }
  0x28   : > { %560 = shalt.err (!%p557_p6)
}
  0x29   : > { %s628_s13 = smov 512   ;;  %s629_s16 = smov 256  }
  0x2a   : > { %s630_s17 = smov 16   ;;  %p201_p9 = scmp.lt.s32.totalorder %s625_s21, 3 }
  0x2b   : > { %487 = dma.hbm_to_vmem [thread:$0]  (!%p726_p13), %s724_s11, 1280, %s730_s14, %s733_s15, %s628_s13, %s629_s16, %s630_s17  }
  0x2c   : > { %p856_p0 = scmp.ge.s32.totalorder %s625_s21, 1 }
  0x2e   : > { %p202_p2 = pnand %p856_p0, %p201_p9 }
  0x2f   : > { %s758_s23 = sand.u32 (!%p202_p2), 1, %s617_s19   ;;  %p857_p6 = scmp.ne.s32.totalorder (!%p202_p2), %s852_s28, 0 }
  0x30   : > { %205 = sbr.rel (%p202_p2) target bundleno = 416 (0x1a0), region = 32  ;;  %s208_s26 = scalar_lea.sflag (!%p202_p2), [#allocation3], %s758_s23 }
  0x31   : > { %s479_s25 = smul.u32 (!%p202_p2), 80, %s758_s23 }
  0x33   : > { %s762_s7 = scalar_lea.vmem (!%p202_p2), [#allocation2], %s479_s25 }
  0x35   : > { %604 = dma.done.wait (%p857_p6), %s208_s26, 1280  }
  0x36   : > { %606 = vsyncadd (%p857_p6), %s208_s26, 4294966016  ;;  %s466_s11 = sshll.u32 %s758_s23, 4  ;;  %p467_p11 = scmp.ne.s32.totalorder %s686_s22, 0 }
  0x37   : > { %s769_s12 = scalar_lea.vmem [#allocation5], %s466_s11 }
  0x38   : > { %243 = sbr.rel (%p467_p11) target bundleno = 63 (0x3f), region = 40 }
  0x3d   : > { %vm244_vm0 = vcmask 7168   ;;  %v631_v0 = vmov 0.0  }
  0x3e   : > { %245 = vst.msk [vmem:[%s848_s4] sm:$0xff] %vm244_vm0, %v631_v0  ;;  %246 = vst.msk [vmem:[%s849_s5] sm:$0xff] %vm244_vm0, %v631_v0 }
  0x3f PF: > { %v257_v1 = vld [vmem:[%s762_s7 + $0x48] sm:$0xf]  ;;  %vm268_vm1 = vcmask 1043456   ;;  %v256_v2 = vld [vmem:[%s762_s7 + $0x40] sm:$0xf]  ;;  %v255_v3 = vld [vmem:[%s762_s7 + $0x38] sm:$0xff] }
  0x40   : > { %468 = vmatprep.subr.msk.mxu0 %vm268_vm1, %v257_v1  ;;  %v254_v4 = vld [vmem:[%s762_s7 + $0x30] sm:$0xff]  ;;  %v253_v5 = vld [vmem:[%s762_s7 + $0x28] sm:$0xff]  ;;  %v632_v6 = vmov 0.0   ;;  %v252_v7 = vld [vmem:[%s762_s7 + $0x20] sm:$0xff]  ;;  %v633_v8 = vmov 0   ;;  %vm264_vm2 = vcmask 293888  }
  0x41   : > { %469 = vmatpush1.msk.msra.mxu0 %vm268_vm1, %v256_v2  ;;  %339 = vmatprep.mubr.f32.mxu0 %v632_v6  ;;  %v258_v9 = vld [vmem:[%s845_s1] sm:$0xff]  ;;  %v251_v10 = vld [vmem:[%s762_s7 + $0x18] sm:$0xff]  ;;  %v249_v12 = vld [vmem:[%s762_s7 + $0x8] sm:$0xff]  ;;  %s477_s16 = sshll.u32 %s686_s22, 8  ;;  %s378_s17 = sshll.u32 %s769_s12, 4  ;;  %s379_s17 = int_to_ptr.vmem [resolvable:$true] %s378_s17 }
  0x42   : > { %299 = vmatprep.subr.mxu0 %v255_v3  ;;  %532 = vset.pattern.permute.xlu0 %v633_v8  ;;  %v250_v11 = vld [vmem:[%s762_s7 + $0x10] sm:$0xff]  ;;  %v248_v13 = vld [vmem:[%s762_s7] sm:$0xff]  ;;  %s376_s7 = scalar_lea.hbm %s847_s3, %s477_s16  ;;  %s364_s11 = scalar_lea.sflag [#allocation4], %s758_s23 }
  0x43   : > { %300 = vmatpush1.msra.mxu0 %v254_v4  ;;  %261 = vperm.xlu0 %532, %v258_v9   ;;  %v247_v14 = vld [vmem:[%s844_s0] sm:$0xff]  ;;  %s561_s14 = scalar_lea.vmem %s379_s17, 256  ;;  %p858_p13 = scmp.ne.s32.totalorder %s853_s29, 0 }
  0x44   : > { %301 = vmatprep.subr.mxu0 %v253_v5  ;;  %p562_p12 = scmp.ne.s32.totalorder %s379_s17, %s561_s14  ;;  %s634_s15 = smov [#allocation5]  }
  0x45   : > { %302 = vmatpush1.msra.mxu0 %v252_v7  ;;  %s565_s6 = sshll.u32 %s634_s15, 4  ;;  %s566_s6 = int_to_ptr.vmem [resolvable:$false] %s565_s6 }
  0x46   : > { %303 = vmatprep.subr.mxu0 %v251_v10  ;;  %p563_p4 = pnand %p562_p12, %p858_p13  ;;  %s567_s8 = scalar_lea.vmem %s566_s6, 512 }
  0x47   : > { %304 = vmatpush1.msra.mxu0 %v250_v11  ;;  %p568_p7 = scmp.lt.s32.totalorder %s379_s17, %s566_s6  ;;  %p569_p8 = scmp.lt.s32.totalorder %s567_s8, %s561_s14 }
  0x48   : > { %305 = vmatprep.subr.mxu0 %v249_v12  ;;  %p564_p5 = pneg %p563_p4 }
  0x49   : > { %306 = vmatpush1.msra.mxu0 %v248_v13  ;;  %p570_p10 = por %p569_p8, %p568_p7 }
  0x4a   : > { %470 = vmatmul.mubr.msk.f32.vlgmr.msra.gmra.mxu0 %vm264_vm2, %v247_v14 }
  0x4b   : > { %p571_p1 = pnand %p570_p10, %p564_p5 }
  0xbe   : > { %v262_v15 = vpop.permute.xlu0 %261 }
 0x10a   : > { %v341_v16 = vpop.f32.mrf.mxu0 }
 0x10b   : > { %v342_v17 = vadd.f32 %v341_v16, %v262_v15 }
 0x10c   : > { %v343_v18 = vpop.f32.mrf.mxu0 }
 0x10d   : > { %346 = vst [vmem:[%s769_s12] sm:$0xff] %v342_v17  ;;  %v344_v19 = vadd.f32 %v343_v18, %v262_v15  ;;  %v356_v21 = vmul.f32 %v342_v17, %v342_v17 }
 0x10f   : > { %347 = vst [vmem:[%s769_s12 + $0x8] sm:$0xff] %v344_v19  ;;  %v349_v20 = vadd.f32 %v344_v19, %v342_v17  ;;  %v357_v22 = vmul.f32 %v344_v19, %v344_v19 }
 0x111   : > { %350 = vadd.xlane.f32.xlu0 %v349_v20  ;;  %v358_v23 = vadd.f32 %v357_v22, %v356_v21 }
 0x113   : > { %359 = vadd.xlane.f32.xlu1 %v358_v23 }
 0x114   : > { %574 = shalt.err (!%p571_p1)
}
 0x115   : > { %s575_s22 = scalar_lea.hbm %s376_s7, 256  ;;  %s579_s28 = scalar_lea.hbm %s847_s3, 512 }
 0x116   : > { %p576_p3 = scmp.ne.s32.totalorder %s376_s7, %s575_s22  ;;  %p580_p2 = scmp.lt.s32.totalorder %s376_s7, %s847_s3 }
 0x117   : > { %p581_p6 = scmp.lt.s32.totalorder %s579_s28, %s575_s22 }
 0x118   : > { %p577_p9 = pnand %p576_p3, %p858_p13 }
 0x119   : > { %p582_p11 = por %p581_p6, %p580_p2 }
 0x11a   : > { %p578_p0 = pneg %p577_p9 }
 0x11c   : > { %p583_p12 = pnand %p582_p11, %p578_p0 }
 0x11e   : > { %586 = shalt.err (!%p583_p12)
}
 0x11f   : > { %482 = dma.vmem_to_hbm [thread:$0]  (%p858_p13), %s379_s17, 256, %s376_s7, %s364_s11   ;;  %v348_v24 = vld [vmem:[%s848_s4] sm:$0xff]  ;;  %vm353_vm3 = vcmask 7168  }
 0x120   : > { %v355_v26 = vld [vmem:[%s849_s5] sm:$0xff] }
 0x19a   : > { %v351_v25 = vpop.xlane.xlu0 %350 }
 0x19b   : > { %v352_v27 = vadd.f32 %v351_v25, %v348_v24 }
 0x19c   : > { %v360_v28 = vpop.xlane.xlu1 %359 }
 0x19d   : > { %354 = vst.msk [vmem:[%s848_s4] sm:$0xff] %vm353_vm3, %v352_v27  ;;  %v361_v29 = vadd.f32 %v360_v28, %v355_v26 }
 0x19f   : > { %362 = vst.msk [vmem:[%s849_s5] sm:$0xff] %vm353_vm3, %v361_v29 }
 0x1a0 PF: > { %s402_s17 = sand.u32 1, %s613_s18   ;;  %p859_p13 = scmp.ne.s32.totalorder %s854_s30, 0 }
 0x1a1   : > { %p860_p4 = scmp.ge.s32.totalorder %s625_s21, 2  ;;  %s403_s7 = scalar_lea.sflag [#allocation4], %s402_s17 }
 0x1a3   : > { %p489_p5 = pnand %p860_p4, %p859_p13 }
 0x1a5   : > { %p490_p7 = pneg %p489_p5 }
 0x1a7   : > { %608 = dma.done.wait (%p490_p7), %s403_s7, 256  }
 0x1a8   : > { %610 = vsyncadd (%p490_p7), %s403_s7, 4294967040  ;;  %p19_p8 = scmp.ge.s32.totalorder %s690_s24, 4   ;;  %s861_s18 = smov %s617_s19 }
 0x1a9   : > { %s862_s19 = smov %s621_s20  ;;  %s863_s20 = smov %s702_s27 }
 0x1aa   : > { %s864_s21 = smov %s690_s24  ;;  %21 = sbr.rel (!%p19_p8) target bundleno = 5 (0x5), region = 97 }
 0x1af   :  { %408 = vsyncpa [#allocation3], 1 }
 0x1b0   :  { %410 = vsyncpa [#allocation3 + $0x1], 1 }
 0x1b1   :  { %411 = vsyncpa [#allocation4], 1 }
 0x1b2   :  { %413 = vsyncpa [#allocation4 + $0x1], 1 }

</bundles_post_ra>
